<compile_context>
chip_gen: v6e
topology: v6e:2x2x1
jax: 0.10.0
libtpu: 0.0.40
codegen_flags: <defaults>
</compile_context>

<pallas_src>
import jax
import jax.numpy as jnp
from jax.experimental import pallas as pl
from jax.experimental.pallas import tpu as pltpu


def _conv1x1_reduce_kernel(x_ref, w_ref, b_ref, o_ref):
    """One grid step: accumulate one channel tile of the reduction.

    x_ref: (tile_n, tile_c, tile_hw)   activations, native dtype
    w_ref: (num_c_tiles, tile_c) f32   full weight table, resident in VMEM
    b_ref: (1,) f32 in SMEM            bias scalar
    o_ref: (tile_n, tile_hw) f32       output block, resident across the C axis
    """
    k = pl.program_id(2)

    @pl.when(k == 0)
    def _init():
        o_ref[...] = jnp.zeros_like(o_ref)

    # Row k of the resident weight table = weights for this channel tile.
    w_row = w_ref[pl.ds(k, 1), :].astype(x_ref.dtype)        # (1, tile_c)

    # Per batch row: (1, tile_c) @ (tile_c, tile_hw) on the MXU, f32 accumulate.
    tile_n = x_ref.shape[0]
    parts = [
        jnp.dot(w_row, x_ref[b], preferred_element_type=jnp.float32)
        for b in range(tile_n)
    ]
    contrib = parts[0] if tile_n == 1 else jnp.concatenate(parts, axis=0)
    o_ref[...] += contrib

    @pl.when(k == pl.num_programs(2) - 1)
    def _bias():
        o_ref[...] += b_ref[0]


def _divisors(x):
    return [d for d in range(1, x + 1) if x % d == 0]


def _choose_tiles(n, c, hw, itemsize, max_block_bytes):
    """Pick (tile_n, tile_c, tile_hw) that exactly divide (N, C, HW).

    Priorities (per perf review):
      1) full HW rows per block (contiguous HBM runs); split HW only if even a
         minimal-channel slab would not fit, and only into multiple-of-128
         divisors (no HBM padding, no ragged tails).
      2) largest multiple-of-8 divisor of C that fits (full C preferred).
      3) group batch rows (largest divisor of N <= 8 that still fits) for
         sublane-dense output stores.
      4) keep >= 2 parallel grid tiles so both TensorCores get work on v7x.
    """
    min_c = min(c, 8)

    # 1) HW tile.
    tile_hw = hw
    if min_c * hw * itemsize > max_block_bytes:
        cands = [d for d in _divisors(hw)
                 if d % 128 == 0 and min_c * d * itemsize <= max_block_bytes]
        if cands:
            tile_hw = max(cands)
        # else: no clean multiple-of-128 divisor; keep full HW (still correct,
        # just a larger block).
        # TODO(synk): in-kernel masking of a ragged HW tail would allow
        # arbitrary tile_hw here without HBM padding.

    # 2) C tile.
    tile_c = c
    if c * tile_hw * itemsize > max_block_bytes:
        cands = [d for d in _divisors(c)
                 if d % 8 == 0 and d * tile_hw * itemsize <= max_block_bytes]
        if cands:
            tile_c = max(cands)

    # 3) Batch grouping.
    tile_n = 1
    for d in _divisors(n):
        if d <= 8 and d * tile_c * tile_hw * itemsize <= max_block_bytes:
            tile_n = max(tile_n, d)

    # 4) Megacore: make sure the parallel axes have extent >= 2 when possible.
    if (n // tile_n) * (hw // tile_hw) < 2:
        if tile_hw % 256 == 0:
            tile_hw //= 2
        elif tile_n > 1:
            tile_n = max(d for d in _divisors(n) if d < tile_n)

    return tile_n, tile_c, tile_hw


def conv1x1_feature_reduce(x_nchw, weight, bias, *, max_block_bytes=8 * 1024 * 1024):
    """Equivalent of CNN_FeatureReduce_sat.forward (nn.Conv2d(C, 1, 1)).

    x_nchw:  (N, C, H, W)  any float dtype (streamed as-is)
    weight:  (1, C, 1, 1)  PyTorch Conv2d weight layout
    bias:    (1,)
    returns: (N, 1, H, W)  float32
    """
    n, c, h, w = x_nchw.shape
    hw = h * w

    x_flat = x_nchw.reshape(n, c, hw)                     # no dtype cast
    itemsize = jnp.dtype(x_flat.dtype).itemsize

    tile_n, tile_c, tile_hw = _choose_tiles(n, c, hw, itemsize, max_block_bytes)
    assert n % tile_n == 0 and c % tile_c == 0 and hw % tile_hw == 0

    num_k = c // tile_c
    # Weight table: row k holds the weights of channel tile k -> one resident
    # VMEM buffer, sliced per grid step inside the kernel.
    w2d = weight.astype(jnp.float32).reshape(num_k, tile_c)
    b_vec = bias.astype(jnp.float32).reshape(1)

    grid = (n // tile_n, hw // tile_hw, num_k)

    # VMEM budget: double-buffered x blocks + output blocks + weight + slack.
    x_block_bytes = tile_n * tile_c * tile_hw * itemsize
    out_block_bytes = tile_n * tile_hw * 4
    vmem_needed = 2 * (x_block_bytes + out_block_bytes + c * 4) + (4 << 20)
    vmem_limit = int(max(vmem_needed, 32 << 20))

    out = pl.pallas_call(
        _conv1x1_reduce_kernel,
        out_shape=jax.ShapeDtypeStruct((n // tile_n, tile_n, hw), jnp.float32),
        grid_spec=pltpu.PrefetchScalarGridSpec(
            num_scalar_prefetch=0,
            grid=grid,
            in_specs=[
                # Streaming x tiles: batch group i, channel tile k, HW tile j.
                pl.BlockSpec((tile_n, tile_c, tile_hw), lambda i, j, k: (i, k, j)),
                # Full weight table, constant index -> DMA'd once, resident.
                pl.BlockSpec((num_k, tile_c), lambda i, j, k: (0, 0)),
                # Bias scalar in SMEM.
                pl.BlockSpec(memory_space=pltpu.MemorySpace.SMEM),
            ],
            # Output block ignores k -> resident across the reduction axis.
            out_specs=pl.BlockSpec((None, tile_n, tile_hw), lambda i, j, k: (i, 0, j)),
        ),
        compiler_params=pltpu.CompilerParams(
            dimension_semantics=("parallel", "parallel", "arbitrary"),
            vmem_limit_bytes=vmem_limit,
        ),
    )(x_flat, w2d, b_vec)

    return out.reshape(n, 1, h, w)


if __name__ == "__main__":
    # Small shapes consistent with the module (input_channels=C, 1x1 conv).
    N, C, H, W = 2, 32, 16, 16

    key = jax.random.PRNGKey(0)
    kx, kw, kb = jax.random.split(key, 3)

    x = jax.random.normal(kx, (N, C, H, W), dtype=jnp.float32)
    # Deterministic synthetic parameters (same shapes as nn.Conv2d(C, 1, 1)).
    weight = jax.random.normal(kw, (1, C, 1, 1), dtype=jnp.float32) * 0.1
    bias = jax.random.normal(kb, (1,), dtype=jnp.float32) * 0.1

    # Reference in plain JAX.
    ref = jnp.einsum("nchw,c->nhw", x, weight.reshape(C))[:, None, :, :] + bias[0]

    # 1) Default block budget: batch grouping + resident weight, HW split for
    #    megacore parallelism.
    out1 = jax.block_until_ready(conv1x1_feature_reduce(x, weight, bias))

    # 2) Tiny block budget: forces channel tiling and exercises the
    #    k-accumulation (output-resident) path.
    out2 = jax.block_until_ready(
        conv1x1_feature_reduce(x, weight, bias, max_block_bytes=16 * 1024))

    assert out1.shape == (N, 1, H, W)
    assert out2.shape == (N, 1, H, W)
    assert jnp.allclose(out1, ref, atol=1e-5, rtol=1e-5)
    assert jnp.allclose(out2, ref, atol=1e-5, rtol=1e-5)

    print("KERNEL_OK")
</pallas_src>

<mosaic_0001>
module attributes {stable_mosaic.version = 11 : i64} {
  func.func @_conv1x1_reduce_kernel(%arg0: i32, %arg1: i32, %arg2: i32, %arg3: memref<2x32x128xf32, #tpu.memory_space<vmem>>, %arg4: memref<1x32xf32, #tpu.memory_space<vmem>>, %arg5: memref<1xf32, #tpu.memory_space<smem>>, %arg6: memref<1x2x128xf32, #tpu.memory_space<vmem>>) attributes {dimension_semantics = [#tpu.dimension_semantics<parallel>, #tpu.dimension_semantics<parallel>, #tpu.dimension_semantics<arbitrary>], iteration_bounds = array<i64: 1, 2, 1>, scalar_prefetch = 0 : i64, scratch_operands = 0 : i64, tpu.core_type = #tpu.core_type<tc>, window_params = [{transform_indices = @transform_0, window_bounds = array<i64: 2, 32, 128>}, {pipeline_mode = #tpu.pipeline_mode<synchronous>, transform_indices = @transform_1, window_bounds = array<i64: 1, 32>}, {transform_indices = @transform_2, window_bounds = array<i64: 1>}, {transform_indices = @transform_3, window_bounds = array<i64: 1, 2, 128>}]} {
    %c0_i32 = arith.constant 0 : i32
    %0 = arith.cmpi eq, %arg2, %c0_i32 : i32
    %1 = arith.extui %0 : i1 to i32
    %c0_i32_0 = arith.constant 0 : i32
    %2 = arith.cmpi ne, %1, %c0_i32_0 : i32
    scf.if %2 {
      %cst_15 = arith.constant 0.000000e+00 : f32
      %21 = vector.broadcast %cst_15 : f32 to vector<2x128xf32>
      %c0_16 = arith.constant 0 : index
      %c0_17 = arith.constant 0 : index
      %c0_18 = arith.constant 0 : index
      %22 = vector.load %arg6[%c0_16, %c0_17, %c0_18] : memref<1x2x128xf32, #tpu.memory_space<vmem>>, vector<1x2x128xf32>
      %23 = vector.shape_cast %22 : vector<1x2x128xf32> to vector<2x128xf32>
      %24 = vector.shape_cast %21 : vector<2x128xf32> to vector<1x2x128xf32>
      tpu.vector_store %arg6[%c0_16, %c0_17, %c0_18], %24 {strides = array<i32>} : memref<1x2x128xf32, #tpu.memory_space<vmem>>, vector<1x2x128xf32>,
    } else {
    }
    %3 = arith.index_cast %arg2 : i32 to index
    %c0 = arith.constant 0 : index
    %4 = vector.load %arg4[%3, %c0] : memref<1x32xf32, #tpu.memory_space<vmem>>, vector<1x32xf32>
    %c0_1 = arith.constant 0 : index
    %c0_2 = arith.constant 0 : index
    %c0_3 = arith.constant 0 : index
    %5 = vector.load %arg3[%c0_1, %c0_2, %c0_3] : memref<2x32x128xf32, #tpu.memory_space<vmem>>, vector<1x32x128xf32>
    %6 = vector.shape_cast %5 : vector<1x32x128xf32> to vector<32x128xf32>
    %cst = arith.constant dense<0.000000e+00> : vector<1x128xf32>
    %7 = tpu.matmul %4, %6, %cst {dimension_numbers = #tpu.dot_dimension_numbers<[1], [0], [0], [1], [0, 0, 1, 1], [], []>} : vector<1x32xf32>, vector<32x128xf32>, vector<1x128xf32> -> vector<1x128xf32>
    %c1 = arith.constant 1 : index
    %c0_4 = arith.constant 0 : index
    %c0_5 = arith.constant 0 : index
    %8 = vector.load %arg3[%c1, %c0_4, %c0_5] : memref<2x32x128xf32, #tpu.memory_space<vmem>>, vector<1x32x128xf32>
    %9 = vector.shape_cast %8 : vector<1x32x128xf32> to vector<32x128xf32>
    %cst_6 = arith.constant dense<0.000000e+00> : vector<1x128xf32>
    %10 = tpu.matmul %4, %9, %cst_6 {dimension_numbers = #tpu.dot_dimension_numbers<[1], [0], [0], [1], [0, 0, 1, 1], [], []>} : vector<1x32xf32>, vector<32x128xf32>, vector<1x128xf32> -> vector<1x128xf32>
    %11 = tpu.concatenate %7, %10 in 0 : vector<1x128xf32>, vector<1x128xf32> -> vector<2x128xf32>
    %c0_7 = arith.constant 0 : index
    %c0_8 = arith.constant 0 : index
    %c0_9 = arith.constant 0 : index
    %12 = vector.load %arg6[%c0_7, %c0_8, %c0_9] : memref<1x2x128xf32, #tpu.memory_space<vmem>>, vector<1x2x128xf32>
    %13 = vector.shape_cast %12 : vector<1x2x128xf32> to vector<2x128xf32>
    %14 = arith.addf %13, %11 : vector<2x128xf32>
    %c0_10 = arith.constant 0 : index
    %c0_11 = arith.constant 0 : index
    %c0_12 = arith.constant 0 : index
    %15 = vector.load %arg6[%c0_10, %c0_11, %c0_12] : memref<1x2x128xf32, #tpu.memory_space<vmem>>, vector<1x2x128xf32>
    %16 = vector.shape_cast %15 : vector<1x2x128xf32> to vector<2x128xf32>
    %17 = vector.shape_cast %14 : vector<2x128xf32> to vector<1x2x128xf32>
    tpu.vector_store %arg6[%c0_10, %c0_11, %c0_12], %17 {strides = array<i32>} : memref<1x2x128xf32, #tpu.memory_space<vmem>>, vector<1x2x128xf32>,
    %c0_i32_13 = arith.constant 0 : i32
    %18 = arith.cmpi eq, %arg2, %c0_i32_13 : i32
    %19 = arith.extui %18 : i1 to i32
    %c0_i32_14 = arith.constant 0 : i32
    %20 = arith.cmpi ne, %19, %c0_i32_14 : i32
    scf.if %20 {
      %c0_15 = arith.constant 0 : index
      %c0_16 = arith.constant 0 : index
      %c0_17 = arith.constant 0 : index
      %21 = vector.load %arg6[%c0_15, %c0_16, %c0_17] : memref<1x2x128xf32, #tpu.memory_space<vmem>>, vector<1x2x128xf32>
      %22 = vector.shape_cast %21 : vector<1x2x128xf32> to vector<2x128xf32>
      %c0_18 = arith.constant 0 : index
      %23 = memref.load %arg5[%c0_18] : memref<1xf32, #tpu.memory_space<smem>>
      %24 = vector.broadcast %23 : f32 to vector<2x128xf32>
      %25 = arith.addf %22, %24 : vector<2x128xf32>
      %c0_19 = arith.constant 0 : index
      %c0_20 = arith.constant 0 : index
      %c0_21 = arith.constant 0 : index
      %26 = vector.load %arg6[%c0_19, %c0_20, %c0_21] : memref<1x2x128xf32, #tpu.memory_space<vmem>>, vector<1x2x128xf32>
      %27 = vector.shape_cast %26 : vector<1x2x128xf32> to vector<2x128xf32>
      %28 = vector.shape_cast %25 : vector<2x128xf32> to vector<1x2x128xf32>
      tpu.vector_store %arg6[%c0_19, %c0_20, %c0_21], %28 {strides = array<i32>} : memref<1x2x128xf32, #tpu.memory_space<vmem>>, vector<1x2x128xf32>,
    } else {
    }
    return
  }
  func.func @transform_0(%arg0: i32, %arg1: i32, %arg2: i32) -> (i32, i32, i32) {
    %c0_i32 = arith.constant 0 : i32
    return %arg0, %arg2, %arg1 : i32, i32, i32
  }
  func.func @transform_1(%arg0: i32, %arg1: i32, %arg2: i32) -> (i32, i32) {
    %c0_i32 = arith.constant 0 : i32
    %c0_i32_0 = arith.constant 0 : i32
    %c0_i32_1 = arith.constant 0 : i32
    return %c0_i32, %c0_i32_0 : i32, i32
  }
  func.func @transform_2(%arg0: i32, %arg1: i32, %arg2: i32) -> i32 {
    %c0_i32 = arith.constant 0 : i32
    %c0_i32_0 = arith.constant 0 : i32
    return %c0_i32 : i32
  }
  func.func @transform_3(%arg0: i32, %arg1: i32, %arg2: i32) -> (i32, i32, i32) {
    %c0_i32 = arith.constant 0 : i32
    %c0_i32_0 = arith.constant 0 : i32
    return %arg0, %c0_i32, %arg1 : i32, i32, i32
  }
}

</mosaic_0001>

<bundles_post_ra>
// kernel: tpu_custom_call.1
= control target key start
LH: loop header
LB: loop body
LE: loop exit
PB: predicated region body
PF: predicated region fallthrough
CT: control target
= control target key end

     0   :  { %s894_s0 = inlined_call_operand.hbm [shape: f32[2,32,256], index: 0, kind: input, shape index: {}]   ;;  %s895_s1 = inlined_call_operand.vmem [shape: f32[1,32], index: 1, kind: input, shape index: {}]   ;;  %s896_s2 = inlined_call_operand.<no memory space> [shape: f32[1], index: 2, kind: input, shape index: {}]   ;;  %s897_s3 = inlined_call_operand.hbm [shape: f32[1,2,256], index: 3, kind: output, shape index: {}]  }
   0x1   :  { %8 = sst [smem:[#allocation2]] %s896_s2 }
   0x2   :  { %9 = vsyncpa [#allocation4], 0 }
   0x3   :  { %11 = vsyncpa [#allocation4 + $0x1], 0 }
   0x4   :  { %12 = vsyncpa [#allocation5], 0 }
   0x5   :  { %14 = vsyncpa [#allocation5 + $0x1], 0  ;;  %s760_s14 = smov 0   ;;  %s762_s15 = smov 0  }
   0x6   :  { %s764_s16 = smov 0   ;;  %s766_s17 = smov 0  }
   0x7   :  { %s768_s18 = smov 0   ;;  %s770_s19 = smov 0  }
   0x8 LB: > { %s502_s2 = sadd.s32 4294967295, %s728_s19   ;;  %s503_s20 = sadd.s32 4294967294, %s728_s19   ;;  %s728_s19 = sphi %s770_s19, %s20_s19   ;;  %s724_s18 = sphi %s768_s18, %s908_s18   ;;  %s720_s17 = sphi %s766_s17, %s907_s17   ;;  %s716_s16 = sphi %s764_s16, %s906_s16   ;;  %s712_s15 = sphi %s762_s15, %s905_s15   ;;  %s708_s14 = sphi %s760_s14, %s904_s14  }
   0x9   : > { %s35_s21 = sadd.s32 1, %s724_s18  ;;  %s50_s22 = sadd.s32 1, %s716_s16 }
   0xa   : > { %p37_p0 = scmp.ge.s32.totalorder %s35_s21, 2  ;;  %p57_p1 = scmp.ne.s32.totalorder %s716_s16, %s712_s15 }
   0xb   : > { %p58_p2 = scmp.eq.s32.totalorder %s728_s19, 0  ;;  %p63_p3 = scmp.ne.s32.totalorder %s712_s15, %s708_s14 }
   0xc   : > { %s910_s21 = smov (%p37_p0, %s35_s21), 0  ;;  %p64_p5 = scmp.eq.s32.totalorder %s502_s2, 0 }
   0xd   : > { %p801_p4 = por %p58_p2, %p57_p1  ;;  %s46_s24 = ssub.s32 %s724_s18, %s910_s21 }
   0xe   : > { %p131_p6 = scmp.eq.s32.totalorder %s502_s2, 1  ;;  %p48_p7 = scmp.eq.s32.totalorder %s46_s24, 0 }
   0xf   : > { %p807_p8 = por %p64_p5, %p63_p3  ;;  %p137_p10 = scmp.eq.s32.totalorder %s503_s20, 1 }
  0x10   : > { %p811_p9 = por %p131_p6, %p57_p1  ;;  %p565_p13 = scmp.lt.s32.totalorder %s728_s19, 2 }
  0x11   : > { %s816_s27 = scalar_select %p48_p7, %s716_s16, %s50_s22  }
  0x12   : > { %p818_p11 = por %p137_p10, %p63_p3  ;;  %s163_s29 = sand.u32 1, %s716_s16  }
  0x13   : > { %s506_s30 = sshll.u32 %s163_s29, 6  ;;  %s507_s4 = sshll.u32 %s724_s18, 7 }
  0x14   : > { %s178_s7 = scalar_lea.hbm %s894_s0, %s507_s4  ;;  %s167_s8 = scalar_lea.vmem [#allocation3], %s506_s30 }
  0x15   : > { %s179_s9 = sshll.u32 %s167_s8, 4  ;;  %p831_p0 = pnand %p565_p13, %p801_p4  ;;  %s180_s9 = int_to_ptr.vmem [resolvable:$true] %s179_s9 }
  0x16   : > { %s164_s11 = scalar_lea.sflag [#allocation4], %s163_s29  ;;  %s633_s12 = scalar_lea.vmem %s180_s9, 1024 }
  0x17   : > { %p622_p1 = pneg %p831_p0  ;;  %p634_p2 = scmp.ne.s32.totalorder %s180_s9, %s633_s12 }
  0x18   : > { %s730_s13 = smov [#allocation3]  }
  0x19   : > { %p636_p3 = pnand %p634_p2, %p622_p1  ;;  %s638_s2 = sshll.u32 %s730_s13, 4  ;;  %s639_s2 = int_to_ptr.vmem [resolvable:$false] %s638_s2 }
  0x1a   : > { %s640_s20 = scalar_lea.vmem %s639_s2, 2048  ;;  %p641_p6 = scmp.lt.s32.totalorder %s180_s9, %s639_s2 }
  0x1b   : > { %p637_p5 = pneg %p636_p3  ;;  %p642_p7 = scmp.lt.s32.totalorder %s640_s20, %s633_s12 }
  0x1d   : > { %p643_p10 = por %p642_p7, %p641_p6 }
  0x1f   : > { %p644_p12 = pnand %p643_p10, %p637_p5 }
  0x21   : > { %647 = shalt.err (!%p644_p12)
}
  0x22   : > { %s731_s22 = smov 256   ;;  %s732_s23 = smov 128  }
  0x23   : > { %s733_s24 = smov 8   ;;  %p508_p4 = scmp.ge.s32.totalorder %s728_s19, 1 }
  0x24   : > { %560 = dma.hbm_to_vmem [thread:$0]  (!%p831_p0), %s178_s7, 1024, %s180_s9, %s164_s11, %s731_s22, %s732_s23, %s733_s24  }
  0x25   : > { %p187_p13 = scmp.lt.s32.totalorder %s728_s19, 3 }
  0x27   : > { %p188_p1 = pnand %p508_p4, %p187_p13 }
  0x28   : > { %s842_s29 = sand.u32 (!%p188_p1), 1, %s712_s15  }
  0x29   : > { %191 = sbr.rel (%p188_p1) target bundleno = 278 (0x116), region = 32  ;;  %s509_s30 = sshll.u32 (!%p188_p1), %s842_s29, 6 }
  0x2a   : > { %s194_s4 = scalar_lea.sflag (!%p188_p1), [#allocation4], %s842_s29  ;;  %s197_s5 = scalar_lea.vmem (!%p188_p1), [#allocation3], %s509_s30 }
  0x2e   : > { %699 = dma.done.wait (%p807_p8), %s194_s4, 1024  }
  0x2f   : > { %701 = vsyncadd (%p807_p8), %s194_s4, 4294966272  ;;  %v734_v0 = vmov 0.0   ;;  %vm735_vm0 = vmmov 0   ;;  %v232_v1 = vld [vmem:[%s197_s5 + $0x18] sm:$0xff]  ;;  %v231_v3 = vld [vmem:[%s197_s5 + $0x10] sm:$0xff]  ;;  %vm233_vm1 = vcmask 261120  }
  0x30   : > { %531 = vmatprep.subr.mxu0 %v734_v0  ;;  %542 = vmatprep.subr.mxu1 %v734_v0  ;;  %v515_v2 = vld [vmem:[%s197_s5 + $0x38] sm:$0xff]  ;;  %v514_v4 = vld [vmem:[%s197_s5 + $0x30] sm:$0xff]  ;;  %v230_v5 = vld [vmem:[%s197_s5 + $0x8] sm:$0xff]  ;;  %s510_s7 = sshll.u32 %s842_s29, 1  ;;  %vm385_vm2 = vcmask 1040384   ;;  %s394_s9 = sld [smem:[#allocation2]] }
  0x31   : > { %539 = vmatprep.mubr.msk.f32.mxu0 %vm735_vm0, %v734_v0  ;;  %550 = vmatprep.mubr.msk.f32.mxu1 %vm735_vm0, %v734_v0  ;;  %v513_v6 = vld [vmem:[%s197_s5 + $0x28] sm:$0xff]  ;;  %v229_v7 = vld [vmem:[%s197_s5] sm:$0xff]  ;;  %s219_s8 = scalar_lea.vmem [#allocation6], %s510_s7  ;;  %s518_s10 = sshll.u32 %s720_s17, 5 }
  0x32   : > { %532 = vmatpush3.msra.mxu0 %v232_v1  ;;  %543 = vmatpush3.msra.mxu1 %v515_v2  ;;  %v512_v8 = vld [vmem:[%s197_s5 + $0x20] sm:$0xff]  ;;  %226 = vst [vmem:[%s219_s8] sm:$0x3] %v734_v0  ;;  %s414_s11 = sshll.u32 %s219_s8, 4  ;;  %s412_s2 = scalar_lea.hbm %s897_s3, %s518_s10  ;;  %s415_s11 = int_to_ptr.vmem [resolvable:$true] %s414_s11 }
  0x33   : > { %533 = vmatprep.subr.mxu0 %v734_v0  ;;  %544 = vmatprep.subr.mxu1 %v734_v0  ;;  %v228_v9 = vld [vmem:[%s895_s1] sm:$0x1]  ;;  %s399_s20 = scalar_lea.sflag [#allocation5], %s842_s29  ;;  %s648_s22 = scalar_lea.vmem %s415_s11, 32 }
  0x34   : > { %534 = vmatpush3.msra.mxu0 %v231_v3  ;;  %545 = vmatpush3.msra.mxu1 %v514_v4  ;;  %p649_p8 = scmp.ne.s32.totalorder %s415_s11, %s648_s22  ;;  %s736_s23 = smov [#allocation6]  }
  0x35   : > { %535 = vmatprep.subr.mxu0 %v734_v0  ;;  %546 = vmatprep.subr.mxu1 %v734_v0  ;;  %s652_s24 = sshll.u32 %s736_s23, 4  ;;  %s653_s24 = int_to_ptr.vmem [resolvable:$false] %s652_s24 }
  0x36   : > { %536 = vmatpush3.msra.mxu0 %v230_v5  ;;  %547 = vmatpush3.msra.mxu1 %v513_v6  ;;  %v395_v18 = vstv %s394_s9  ;;  %p650_p12 = pnand %p649_p8, %p811_p9  ;;  %s654_s30 = scalar_lea.vmem %s653_s24, 64 }
  0x37   : > { %537 = vmatprep.subr.mxu0 %v734_v0  ;;  %548 = vmatprep.subr.mxu1 %v734_v0  ;;  %p655_p2 = scmp.lt.s32.totalorder %s415_s11, %s653_s24  ;;  %p656_p3 = scmp.lt.s32.totalorder %s654_s30, %s648_s22 }
  0x38   : > { %538 = vmatpush3.msra.mxu0 %v229_v7  ;;  %549 = vmatpush3.msra.mxu1 %v512_v8  ;;  %p651_p0 = pneg %p650_p12 }
  0x39   : > { %540 = vmatmul.mubr.msk.f32.vlgmr.msra.gmra.mxu0 %vm233_vm1, %v228_v9  ;;  %551 = vmatmul.mubr.msk.f32.vlgmr.msra.gmra.mxu1 %vm233_vm1, %v228_v9  ;;  %v387_v13 = vld [vmem:[%s219_s8] sm:$0x3]  ;;  %p657_p5 = por %p656_p3, %p655_p2 }
  0x3b   : > { %p658_p6 = pnand %p657_p5, %p651_p0 }
  0xf9   : > { %v303_v10 = vpop.f32.mrf.mxu0  ;;  %v378_v11 = vpop.f32.mrf.mxu1 }
  0xfa   : > { %v383_v12 = vrot.slane %v378_v11, 7 }
  0xfb   : > { %v541_v14 = vpop.f32.mrf.mxu0  ;;  %v552_v15 = vpop.f32.mrf.mxu1 }
  0xfc   : > { %v386_v16 = vsel %vm385_vm2, %v303_v10, %v383_v12 }
  0xfd   : > { %v388_v17 = vadd.f32 %v387_v13, %v386_v16 }
  0xff   : > { %389 = vst [vmem:[%s219_s8] sm:$0x3] %v388_v17 }
 0x106   : > { %v393_v19 = vld [vmem:[%s219_s8] sm:$0x3] }
 0x107   : > { %v396_v20 = vadd.f32 %v395_v18, %v393_v19 }
 0x109   : > { %397 = vst [vmem:[%s219_s8] sm:$0x3] %v396_v20 }
 0x10a   : > { %661 = shalt.err (!%p658_p6)
}
 0x10b   : > { %s662_s17 = scalar_lea.hbm %s412_s2, 32  ;;  %s666_s5 = scalar_lea.hbm %s897_s3, 64 }
 0x10c   : > { %p663_p7 = scmp.ne.s32.totalorder %s412_s2, %s662_s17  ;;  %p667_p13 = scmp.lt.s32.totalorder %s412_s2, %s897_s3 }
 0x10d   : > { %p668_p1 = scmp.lt.s32.totalorder %s666_s5, %s662_s17 }
 0x10e   : > { %p664_p10 = pnand %p663_p7, %p811_p9 }
 0x10f   : > { %p669_p8 = por %p668_p1, %p667_p13 }
 0x110   : > { %p665_p4 = pneg %p664_p10 }
 0x112   : > { %p670_p12 = pnand %p669_p8, %p665_p4 }
 0x114   : > { %673 = shalt.err (!%p670_p12)
}
 0x115   : > { %555 = dma.vmem_to_hbm [thread:$0]  (%p811_p9), %s415_s11, 32, %s412_s2, %s399_s20  }
 0x116 PF: > { %s426_s7 = sand.u32 1, %s708_s14   ;;  %p903_p0 = scmp.ge.s32.totalorder %s728_s19, 2 }
 0x117   : > { %s427_s8 = scalar_lea.sflag [#allocation5], %s426_s7 }
 0x118   : > { %p562_p2 = pnand %p903_p0, %p818_p11 }
 0x11a   : > { %p563_p3 = pneg %p562_p2 }
 0x11c   : > { %703 = dma.done.wait (%p563_p3), %s427_s8, 32  }
 0x11d   : > { %705 = vsyncadd (%p563_p3), %s427_s8, 4294967264  ;;  %s20_s19 = sadd.s32 1, %s728_s19   ;;  %s904_s14 = smov %s712_s15 }
 0x11e   : > { %p17_p5 = scmp.ge.s32.totalorder %s20_s19, 4   ;;  %s905_s15 = smov %s716_s16 }
 0x11f   : > { %s906_s16 = smov %s816_s27  ;;  %s907_s17 = smov %s724_s18 }
 0x120   : > { %s908_s18 = smov %s910_s21  ;;  %19 = sbr.rel (!%p17_p5) target bundleno = 8 (0x8), region = 87 }
 0x125   :  { %432 = vsyncpa [#allocation4], 1 }
 0x126   :  { %434 = vsyncpa [#allocation4 + $0x1], 1 }
 0x127   :  { %435 = vsyncpa [#allocation5], 1 }
 0x128   :  { %437 = vsyncpa [#allocation5 + $0x1], 1 }

</bundles_post_ra>
